<compile_context>
chip_gen: v7x
topology: tpu7x:2x2x1
jax: 0.10.0
libtpu: 0.0.40
codegen_flags: <defaults>
</compile_context>

<pallas_src>
import numpy as np
import jax
import jax.numpy as jnp
from jax import lax
from jax.experimental import pallas as pl
from jax.experimental.pallas import tpu as pltpu


# -------------------- host-side conv -> dense repacking ----------------------
def _conv1d_as_dense_np(w, b, l_in, *, stride=2, padding=1):
    """PyTorch Conv1d (Cout, Cin, K) -> dense (Cin*Lin, Cout*Lout) + bias row."""
    w = np.asarray(w, np.float32)
    b = np.asarray(b, np.float32)
    c_out, c_in, k = w.shape
    l_out = (l_in + 2 * padding - k) // stride + 1
    kk = np.arange(k)[:, None, None]
    lo = np.arange(l_out)[None, :, None]
    li = np.arange(l_in)[None, None, :]
    # pos[k, lo, li] = 1 iff li == stride*lo + k - padding (zero padding elsewhere)
    pos = (li == stride * lo + kk - padding).astype(np.float32)
    d = np.einsum('oik,kml->ilom', w, pos).reshape(c_in * l_in, c_out * l_out)
    return d, np.repeat(b, l_out), l_out


def _convt1d_as_dense_np(w, b, l_in, *, stride=2, padding=1):
    """PyTorch ConvTranspose1d (Cin, Cout, K) -> dense (Cin*Lin, Cout*Lout) + bias."""
    w = np.asarray(w, np.float32)
    b = np.asarray(b, np.float32)
    c_in, c_out, k = w.shape
    l_out = (l_in - 1) * stride - 2 * padding + k
    kk = np.arange(k)[:, None, None]
    li = np.arange(l_in)[None, :, None]
    lo = np.arange(l_out)[None, None, :]
    # pos[k, li, lo] = 1 iff lo == stride*li + k - padding
    pos = (lo == stride * li + kk - padding).astype(np.float32)
    d = np.einsum('iok,klm->ilom', w, pos).reshape(c_in * l_in, c_out * l_out)
    return d, np.repeat(b, l_out), l_out


def _round_up(n, m):
    return -(-n // m) * m


# -------------------------------- the kernel ---------------------------------
def _make_generator_kernel(layout):
    """Build the kernel as a closure over the static slab layout."""
    L = dict(layout)

    def kernel(x_ref, lam_ref, w_ref, b_ref, o_ref):
        bf = jnp.bfloat16

        def dense(h, name):
            r0, nin, nout, brow = L[name]
            y = jnp.dot(h, w_ref[r0:r0 + nin, :nout],
                        preferred_element_type=jnp.float32)
            if brow is not None:
                y = y + b_ref[brow:brow + 1, :nout]
            return y

        def drelu(h, name):
            return jnp.maximum(dense(h, name), 0.0).astype(bf)

        # Lambda contribution to sim_dense1, computed first so it sits off the
        # serial conditioning chain (hidden in the shadow of the conv stack).
        lam_part = dense(lam_ref[...].astype(bf), "w6_lam")

        # ---------------- conditioning path (4 convs as dense + dense5) ------
        h = drelu(x_ref[...].astype(bf), "conv1")     # cond_conv1 + ReLU
        h = drelu(h, "conv2")                         # cond_conv2 + ReLU
        h = drelu(h, "conv3")                         # cond_conv3 + ReLU
        h = drelu(h, "conv4")                         # cond_conv4 + ReLU (len 1)
        cond = drelu(h, "dense5")                     # cond_dense5 + ReLU

        # ---------------- simulator path --------------------------------------
        s1 = jnp.maximum(dense(cond, "w6_cond") + lam_part, 0.0).astype(bf)
        h = drelu(s1, "convt2")                       # sim_conv2 (ConvT) + ReLU
        o_ref[...] = jnp.tanh(dense(h, "convt3"))     # sim_conv3 (ConvT) + tanh

    return kernel


# ------------------- one-time parameter packing (hoisted) --------------------
def pack_generator_params(params, n_assets, f, t_len):
    """Repack all weights into one bf16 slab + one f32 bias slab (runs once)."""
    (w1, b1, w2, b2, w3, b3, w4, b4, w5, b5, w6, b6, wt2, bt2, wt3, bt3) = [
        np.asarray(p, np.float32) for p in params]

    d1, bb1, l1 = _conv1d_as_dense_np(w1, b1, t_len)
    d2, bb2, l2 = _conv1d_as_dense_np(w2, b2, l1)
    d3, bb3, l3 = _conv1d_as_dense_np(w3, b3, l2)
    d4, bb4, l4 = _conv1d_as_dense_np(w4, b4, l3)
    assert l4 == 1, "cond_dense5 expects the conv stack to reduce length to 1"

    d5, bb5 = w5.T, b5
    # Split sim_dense1: rows 0:nA act on cond_out, rows nA:3nA act on lambda.
    d6c, d6l, bb6 = w6.T[:n_assets, :], w6.T[n_assets:, :], b6

    dt2, bbt2, lt2 = _convt1d_as_dense_np(wt2, bt2, f // 4)
    dt3, bbt3, lt3 = _convt1d_as_dense_np(wt3, bt3, lt2)
    assert lt3 == f

    mats = [("conv1", d1, bb1), ("conv2", d2, bb2), ("conv3", d3, bb3),
            ("conv4", d4, bb4), ("dense5", d5, bb5), ("w6_cond", d6c, bb6),
            ("w6_lam", d6l, None), ("convt2", dt2, bbt2), ("convt3", dt3, bbt3)]

    max_out = max(m.shape[1] for _, m, _ in mats)
    col_w = max(128, _round_up(max_out, 128))       # lane-dense columns

    layout = {}
    row_blocks, bias_rows = [], []
    r = 0
    for name, m, bias in mats:
        nin, nout = m.shape
        nin_pad = _round_up(nin, 16)                # 16-aligned rows (bf16 tile)
        blk = np.zeros((nin_pad, col_w), np.float32)
        blk[:nin, :nout] = m
        row_blocks.append(blk)
        brow = None
        if bias is not None:
            brow = len(bias_rows)
            row = np.zeros((col_w,), np.float32)
            row[:nout] = bias
            bias_rows.append(row)
        layout[name] = (r, nin, nout, brow)
        r += nin_pad

    w_slab = jnp.asarray(np.concatenate(row_blocks, axis=0), jnp.bfloat16)
    nb_pad = _round_up(len(bias_rows), 8)
    b_np = np.zeros((nb_pad, col_w), np.float32)
    b_np[:len(bias_rows)] = np.stack(bias_rows)
    b_slab = jnp.asarray(b_np, jnp.float32)

    flops_per_row = 2 * sum(nin * nout for (_, nin, nout, _) in layout.values())
    weight_bytes = int(w_slab.size) * 2 + int(b_slab.size) * 4

    return dict(w_slab=w_slab, b_slab=b_slab, layout=layout,
                kernel=_make_generator_kernel(layout),
                n_assets=n_assets, f=f, t_len=t_len,
                flops_per_row=flops_per_row, weight_bytes=weight_bytes)


# ---------------------------------- wrapper ----------------------------------
def generator_forward(x, lambd_prior, packed):
    n_assets, f, t_len = packed["n_assets"], packed["f"], packed["t_len"]
    batch = x.shape[0]
    assert x.shape[1] == n_assets and x.shape[2] == t_len

    out_cols = n_assets * f
    cost = pl.CostEstimate(
        flops=packed["flops_per_row"] * batch,
        transcendentals=batch * out_cols,
        bytes_accessed=(packed["weight_bytes"]
                        + x.size * 4 + lambd_prior.size * 4
                        + batch * out_cols * 4))

    out_flat = pl.pallas_call(
        packed["kernel"],
        out_shape=jax.ShapeDtypeStruct((batch, out_cols), jnp.float32),
        in_specs=[pl.BlockSpec(memory_space=pltpu.MemorySpace.VMEM)] * 4,
        out_specs=pl.BlockSpec(memory_space=pltpu.MemorySpace.VMEM),
        cost_estimate=cost,
    )(x.reshape(batch, n_assets * t_len),            # channel-major flatten
      lambd_prior,
      packed["w_slab"], packed["b_slab"])
    return out_flat.reshape(batch, n_assets, f)


# ----------------------- plain-JAX reference (for check) ---------------------
def generator_reference(x, lambd_prior, params):
    (w1, b1, w2, b2, w3, b3, w4, b4, w5, b5, w6, b6, wt2, bt2, wt3, bt3) = params
    batch, n_assets, _ = x.shape
    prec = lax.Precision.HIGHEST

    def conv(h, w, b):
        y = lax.conv_general_dilated(h, w, (2,), [(1, 1)],
                                     dimension_numbers=("NCH", "OIH", "NCH"),
                                     precision=prec)
        return jax.nn.relu(y + b[None, :, None])

    h = conv(x, w1, b1)
    h = conv(h, w2, b2)
    h = conv(h, w3, b3)
    h = conv(h, w4, b4)
    flat = h.reshape(batch, -1)
    cond = jax.nn.relu(jnp.matmul(flat, w5.T, precision=prec) + b5)
    sim_in = jnp.concatenate([cond, lambd_prior], axis=1)
    s1 = jax.nn.relu(jnp.matmul(sim_in, w6.T, precision=prec) + b6)
    f = w6.shape[0] // n_assets
    xs = s1.reshape(batch, 4 * n_assets, f // 4)

    def convt(h, w_pt, b):
        w_oih = jnp.transpose(jnp.flip(w_pt, axis=2), (1, 0, 2))
        y = lax.conv_general_dilated(h, w_oih, (1,), [(2, 2)], lhs_dilation=(2,),
                                     dimension_numbers=("NCH", "OIH", "NCH"),
                                     precision=prec)
        return y + b[None, :, None]

    h = jax.nn.relu(convt(xs, wt2, bt2))
    return jnp.tanh(convt(h, wt3, bt3))


# ------------------------------------ main ------------------------------------
if __name__ == "__main__":
    n_assets, f, T, batch = 4, 8, 32, 2     # T=32 -> conv lengths 15, 7, 3, 1
    key = jax.random.PRNGKey(0)
    keys = jax.random.split(key, 20)

    def u(k, shape, fan_in):
        bound = 1.0 / float(np.sqrt(fan_in))
        return jax.random.uniform(k, shape, jnp.float32, -bound, bound)

    na2 = 2 * n_assets
    params = (
        u(keys[0], (na2, n_assets, 5), n_assets * 5),  u(keys[1], (na2,), n_assets * 5),
        u(keys[2], (na2, na2, 5), na2 * 5),            u(keys[3], (na2,), na2 * 5),
        u(keys[4], (na2, na2, 5), na2 * 5),            u(keys[5], (na2,), na2 * 5),
        u(keys[6], (na2, na2, 5), na2 * 5),            u(keys[7], (na2,), na2 * 5),
        u(keys[8], (n_assets, na2), na2),              u(keys[9], (n_assets,), na2),
        u(keys[10], (f * n_assets, 3 * n_assets), 3 * n_assets),
        u(keys[11], (f * n_assets,), 3 * n_assets),
        u(keys[12], (4 * n_assets, na2, 4), na2 * 4),  u(keys[13], (na2,), na2 * 4),
        u(keys[14], (na2, n_assets, 4), n_assets * 4), u(keys[15], (n_assets,), n_assets * 4),
    )

    # One-time (per weight update) repack -> single bf16 weight slab + f32 biases.
    packed = pack_generator_params(params, n_assets, f, T)

    x = jax.random.normal(keys[16], (batch, n_assets, T), jnp.float32)
    # TODO(synk): the PyTorch forward draws lambd_prior with np.random inside
    # forward(); here it is a deterministic jax.random input for reproducibility.
    lambd = jax.random.normal(keys[17], (batch, na2), jnp.float32)

    out = generator_forward(x, lambd, packed)
    out = jax.block_until_ready(out)

    ref = generator_reference(x, lambd, params)
    np.testing.assert_allclose(np.asarray(out), np.asarray(ref), rtol=2e-2, atol=2e-2)
    print("KERNEL_OK")
</pallas_src>

<mosaic_0001>
module attributes {stable_mosaic.version = 11 : i64} {
  func.func @kernel(%arg0: memref<2x128xf32, #tpu.memory_space<vmem>>, %arg1: memref<2x8xf32, #tpu.memory_space<vmem>>, %arg2: memref<464x128xbf16, #tpu.memory_space<vmem>>, %arg3: memref<8x128xf32, #tpu.memory_space<vmem>>, %arg4: memref<2x32xf32, #tpu.memory_space<vmem>>) attributes {dimension_semantics = [], scalar_prefetch = 0 : i64, scratch_operands = 0 : i64, tpu.core_type = #tpu.core_type<tc>} {
    %c0 = arith.constant 0 : index
    %c0_0 = arith.constant 0 : index
    %0 = vector.load %arg1[%c0, %c0_0] : memref<2x8xf32, #tpu.memory_space<vmem>>, vector<2x8xf32>
    %1 = arith.truncf %0 : vector<2x8xf32> to vector<2x8xbf16>
    %c384 = arith.constant 384 : index
    %c0_1 = arith.constant 0 : index
    %2 = vector.load %arg2[%c384, %c0_1] : memref<464x128xbf16, #tpu.memory_space<vmem>>, vector<8x32xbf16>
    %cst = arith.constant dense<0.000000e+00> : vector<2x32xf32>
    %3 = tpu.matmul %1, %2, %cst {dimension_numbers = #tpu.dot_dimension_numbers<[1], [0], [0], [1], [0, 0, 1, 1], [], []>} : vector<2x8xbf16>, vector<8x32xbf16>, vector<2x32xf32> -> vector<2x32xf32>
    %c0_2 = arith.constant 0 : index
    %c0_3 = arith.constant 0 : index
    %4 = vector.load %arg0[%c0_2, %c0_3] : memref<2x128xf32, #tpu.memory_space<vmem>>, vector<2x128xf32>
    %5 = arith.truncf %4 : vector<2x128xf32> to vector<2x128xbf16>
    %c0_4 = arith.constant 0 : index
    %c0_5 = arith.constant 0 : index
    %6 = vector.load %arg2[%c0_4, %c0_5] : memref<464x128xbf16, #tpu.memory_space<vmem>>, vector<128x120xbf16>
    %cst_6 = arith.constant dense<0.000000e+00> : vector<2x120xf32>
    %7 = tpu.matmul %5, %6, %cst_6 {dimension_numbers = #tpu.dot_dimension_numbers<[1], [0], [0], [1], [0, 0, 1, 1], [], []>} : vector<2x128xbf16>, vector<128x120xbf16>, vector<2x120xf32> -> vector<2x120xf32>
    %c0_7 = arith.constant 0 : index
    %c0_8 = arith.constant 0 : index
    %8 = vector.load %arg3[%c0_7, %c0_8] : memref<8x128xf32, #tpu.memory_space<vmem>>, vector<1x120xf32>
    %9 = vector.broadcast %8 : vector<1x120xf32> to vector<2x120xf32>
    %10 = arith.addf %7, %9 : vector<2x120xf32>
    %cst_9 = arith.constant 0.000000e+00 : f32
    %11 = vector.broadcast %cst_9 : f32 to vector<2x120xf32>
    %12 = arith.maximumf %10, %11 : vector<2x120xf32>
    %13 = arith.truncf %12 : vector<2x120xf32> to vector<2x120xbf16>
    %c128 = arith.constant 128 : index
    %c0_10 = arith.constant 0 : index
    %14 = vector.load %arg2[%c128, %c0_10] : memref<464x128xbf16, #tpu.memory_space<vmem>>, vector<120x56xbf16>
    %cst_11 = arith.constant dense<0.000000e+00> : vector<2x56xf32>
    %15 = tpu.matmul %13, %14, %cst_11 {dimension_numbers = #tpu.dot_dimension_numbers<[1], [0], [0], [1], [0, 0, 1, 1], [], []>} : vector<2x120xbf16>, vector<120x56xbf16>, vector<2x56xf32> -> vector<2x56xf32>
    %c1 = arith.constant 1 : index
    %c0_12 = arith.constant 0 : index
    %16 = vector.load %arg3[%c1, %c0_12] : memref<8x128xf32, #tpu.memory_space<vmem>>, vector<1x56xf32>
    %17 = vector.broadcast %16 : vector<1x56xf32> to vector<2x56xf32>
    %18 = arith.addf %15, %17 : vector<2x56xf32>
    %cst_13 = arith.constant 0.000000e+00 : f32
    %19 = vector.broadcast %cst_13 : f32 to vector<2x56xf32>
    %20 = arith.maximumf %18, %19 : vector<2x56xf32>
    %21 = arith.truncf %20 : vector<2x56xf32> to vector<2x56xbf16>
    %c256 = arith.constant 256 : index
    %c0_14 = arith.constant 0 : index
    %22 = vector.load %arg2[%c256, %c0_14] : memref<464x128xbf16, #tpu.memory_space<vmem>>, vector<56x24xbf16>
    %cst_15 = arith.constant dense<0.000000e+00> : vector<2x24xf32>
    %23 = tpu.matmul %21, %22, %cst_15 {dimension_numbers = #tpu.dot_dimension_numbers<[1], [0], [0], [1], [0, 0, 1, 1], [], []>} : vector<2x56xbf16>, vector<56x24xbf16>, vector<2x24xf32> -> vector<2x24xf32>
    %c2 = arith.constant 2 : index
    %c0_16 = arith.constant 0 : index
    %24 = vector.load %arg3[%c2, %c0_16] : memref<8x128xf32, #tpu.memory_space<vmem>>, vector<1x24xf32>
    %25 = vector.broadcast %24 : vector<1x24xf32> to vector<2x24xf32>
    %26 = arith.addf %23, %25 : vector<2x24xf32>
    %cst_17 = arith.constant 0.000000e+00 : f32
    %27 = vector.broadcast %cst_17 : f32 to vector<2x24xf32>
    %28 = arith.maximumf %26, %27 : vector<2x24xf32>
    %29 = arith.truncf %28 : vector<2x24xf32> to vector<2x24xbf16>
    %c320 = arith.constant 320 : index
    %c0_18 = arith.constant 0 : index
    %30 = vector.load %arg2[%c320, %c0_18] : memref<464x128xbf16, #tpu.memory_space<vmem>>, vector<24x8xbf16>
    %cst_19 = arith.constant dense<0.000000e+00> : vector<2x8xf32>
    %31 = tpu.matmul %29, %30, %cst_19 {dimension_numbers = #tpu.dot_dimension_numbers<[1], [0], [0], [1], [0, 0, 1, 1], [], []>} : vector<2x24xbf16>, vector<24x8xbf16>, vector<2x8xf32> -> vector<2x8xf32>
    %c3 = arith.constant 3 : index
    %c0_20 = arith.constant 0 : index
    %32 = vector.load %arg3[%c3, %c0_20] : memref<8x128xf32, #tpu.memory_space<vmem>>, vector<1x8xf32>
    %33 = vector.broadcast %32 : vector<1x8xf32> to vector<2x8xf32>
    %34 = arith.addf %31, %33 : vector<2x8xf32>
    %cst_21 = arith.constant 0.000000e+00 : f32
    %35 = vector.broadcast %cst_21 : f32 to vector<2x8xf32>
    %36 = arith.maximumf %34, %35 : vector<2x8xf32>
    %37 = arith.truncf %36 : vector<2x8xf32> to vector<2x8xbf16>
    %c352 = arith.constant 352 : index
    %c0_22 = arith.constant 0 : index
    %38 = vector.load %arg2[%c352, %c0_22] : memref<464x128xbf16, #tpu.memory_space<vmem>>, vector<8x4xbf16>
    %cst_23 = arith.constant dense<0.000000e+00> : vector<2x4xf32>
    %39 = tpu.matmul %37, %38, %cst_23 {dimension_numbers = #tpu.dot_dimension_numbers<[1], [0], [0], [1], [0, 0, 1, 1], [], []>} : vector<2x8xbf16>, vector<8x4xbf16>, vector<2x4xf32> -> vector<2x4xf32>
    %c4 = arith.constant 4 : index
    %c0_24 = arith.constant 0 : index
    %40 = vector.load %arg3[%c4, %c0_24] : memref<8x128xf32, #tpu.memory_space<vmem>>, vector<1x4xf32>
    %41 = vector.broadcast %40 : vector<1x4xf32> to vector<2x4xf32>
    %42 = arith.addf %39, %41 : vector<2x4xf32>
    %cst_25 = arith.constant 0.000000e+00 : f32
    %43 = vector.broadcast %cst_25 : f32 to vector<2x4xf32>
    %44 = arith.maximumf %42, %43 : vector<2x4xf32>
    %45 = arith.truncf %44 : vector<2x4xf32> to vector<2x4xbf16>
    %c368 = arith.constant 368 : index
    %c0_26 = arith.constant 0 : index
    %46 = vector.load %arg2[%c368, %c0_26] : memref<464x128xbf16, #tpu.memory_space<vmem>>, vector<4x32xbf16>
    %cst_27 = arith.constant dense<0.000000e+00> : vector<2x32xf32>
    %47 = tpu.matmul %45, %46, %cst_27 {dimension_numbers = #tpu.dot_dimension_numbers<[1], [0], [0], [1], [0, 0, 1, 1], [], []>} : vector<2x4xbf16>, vector<4x32xbf16>, vector<2x32xf32> -> vector<2x32xf32>
    %c5 = arith.constant 5 : index
    %c0_28 = arith.constant 0 : index
    %48 = vector.load %arg3[%c5, %c0_28] : memref<8x128xf32, #tpu.memory_space<vmem>>, vector<1x32xf32>
    %49 = vector.broadcast %48 : vector<1x32xf32> to vector<2x32xf32>
    %50 = arith.addf %47, %49 : vector<2x32xf32>
    %51 = arith.addf %50, %3 : vector<2x32xf32>
    %cst_29 = arith.constant 0.000000e+00 : f32
    %52 = vector.broadcast %cst_29 : f32 to vector<2x32xf32>
    %53 = arith.maximumf %51, %52 : vector<2x32xf32>
    %54 = arith.truncf %53 : vector<2x32xf32> to vector<2x32xbf16>
    %c400 = arith.constant 400 : index
    %c0_30 = arith.constant 0 : index
    %55 = vector.load %arg2[%c400, %c0_30] : memref<464x128xbf16, #tpu.memory_space<vmem>>, vector<32x32xbf16>
    %cst_31 = arith.constant dense<0.000000e+00> : vector<2x32xf32>
    %56 = tpu.matmul %54, %55, %cst_31 {dimension_numbers = #tpu.dot_dimension_numbers<[1], [0], [0], [1], [0, 0, 1, 1], [], []>} : vector<2x32xbf16>, vector<32x32xbf16>, vector<2x32xf32> -> vector<2x32xf32>
    %c6 = arith.constant 6 : index
    %c0_32 = arith.constant 0 : index
    %57 = vector.load %arg3[%c6, %c0_32] : memref<8x128xf32, #tpu.memory_space<vmem>>, vector<1x32xf32>
    %58 = vector.broadcast %57 : vector<1x32xf32> to vector<2x32xf32>
    %59 = arith.addf %56, %58 : vector<2x32xf32>
    %cst_33 = arith.constant 0.000000e+00 : f32
    %60 = vector.broadcast %cst_33 : f32 to vector<2x32xf32>
    %61 = arith.maximumf %59, %60 : vector<2x32xf32>
    %62 = arith.truncf %61 : vector<2x32xf32> to vector<2x32xbf16>
    %c432 = arith.constant 432 : index
    %c0_34 = arith.constant 0 : index
    %63 = vector.load %arg2[%c432, %c0_34] : memref<464x128xbf16, #tpu.memory_space<vmem>>, vector<32x32xbf16>
    %cst_35 = arith.constant dense<0.000000e+00> : vector<2x32xf32>
    %64 = tpu.matmul %62, %63, %cst_35 {dimension_numbers = #tpu.dot_dimension_numbers<[1], [0], [0], [1], [0, 0, 1, 1], [], []>} : vector<2x32xbf16>, vector<32x32xbf16>, vector<2x32xf32> -> vector<2x32xf32>
    %c7 = arith.constant 7 : index
    %c0_36 = arith.constant 0 : index
    %65 = vector.load %arg3[%c7, %c0_36] : memref<8x128xf32, #tpu.memory_space<vmem>>, vector<1x32xf32>
    %66 = vector.broadcast %65 : vector<1x32xf32> to vector<2x32xf32>
    %67 = arith.addf %64, %66 : vector<2x32xf32>
    %68 = math.tanh %67 : vector<2x32xf32>
    %c0_37 = arith.constant 0 : index
    %c0_38 = arith.constant 0 : index
    %69 = vector.load %arg4[%c0_37, %c0_38] : memref<2x32xf32, #tpu.memory_space<vmem>>, vector<2x32xf32>
    tpu.vector_store %arg4[%c0_37, %c0_38], %68 {strides = array<i32>} : memref<2x32xf32, #tpu.memory_space<vmem>>, vector<2x32xf32>,
    return
  }
}

</mosaic_0001>

<bundles_post_ra>
// kernel: tpu_custom_call.1
= control target key start
LH: loop header
LB: loop body
LE: loop exit
PB: predicated region body
PF: predicated region fallthrough
CT: control target
= control target key end

     0   :  { %9 = vsyncpa [#allocation3], 0  ;;  %s1176_s0 = inlined_call_operand.hbm [shape: f32[2,128], index: 0, kind: input, shape index: {}]   ;;  %s1177_s1 = inlined_call_operand.vmem [shape: f32[2,8], index: 1, kind: input, shape index: {}]   ;;  %s1178_s2 = inlined_call_operand.hbm [shape: bf16[464,128], index: 2, kind: input, shape index: {}]   ;;  %s1179_s3 = inlined_call_operand.vmem [shape: f32[8,128], index: 3, kind: input, shape index: {}]   ;;  %s1180_s4 = inlined_call_operand.hbm [shape: f32[2,32], index: 4, kind: output, shape index: {}]  }
   0x1   :  { %10 = vsyncpa [#allocation6], 0 }
   0x2   :  { %11 = vsyncpa [#allocation4], 0  ;;  %s1018_s15 = smov [#allocation2]   ;;  %s1019_s17 = smov [#allocation5]  }
   0x3   :  { %s18_s16 = sshll.u32 %s1018_s15, 4  ;;  %s29_s18 = sshll.u32 %s1019_s17, 4  ;;  %s19_s16 = int_to_ptr.vmem [resolvable:$true] %s18_s16  ;;  %s1050_s18 = int_to_ptr.vmem [resolvable:$true] %s29_s18 }
   0x4   :  { %s946_s21 = scalar_lea.hbm %s1176_s0, 32 }
   0x5   :  { %p947_p0 = scmp.ne.s32.totalorder %s1176_s0, %s946_s21  ;;  %p950_p1 = scmp.lt.u32.totalorder %s946_s21, %s1176_s0 }
   0x7   :  { %p952_p2 = pnand %p950_p1, %p947_p0 }
   0x9   :  { %955 = shalt.err (!%p952_p2)
}
   0xa   :  { %s956_s26 = scalar_lea.vmem %s19_s16, 32  ;;  %p961_p4 = scmp.lt.s32.totalorder %s19_s16, %s19_s16 }
   0xb   :  { %p957_p3 = scmp.ne.s32.totalorder %s19_s16, %s956_s26  ;;  %p962_p5 = scmp.lt.s32.totalorder %s956_s26, %s956_s26 }
   0xd   :  { %p963_p6 = por %p962_p5, %p961_p4 }
   0xf   :  { %p964_p7 = pnand %p963_p6, %p957_p3 }
  0x11   :  { %967 = shalt.err (!%p964_p7)
}
  0x12   :  { %21 = dma.hbm_to_vmem [thread:$0]  %s1176_s0, 32, %s19_s16, [#allocation3]  }
  0x13   :  { %s968_s5 = scalar_lea.hbm %s1178_s2, 3712 }
  0x14   :  { %p969_p8 = scmp.ne.s32.totalorder %s1178_s2, %s968_s5  ;;  %p972_p9 = scmp.lt.u32.totalorder %s968_s5, %s1178_s2 }
  0x16   :  { %p974_p10 = pnand %p972_p9, %p969_p8 }
  0x18   :  { %977 = shalt.err (!%p974_p10)
}
  0x19   :  { %s978_s10 = scalar_lea.vmem %s1050_s18, 3712  ;;  %p983_p12 = scmp.lt.s32.totalorder %s1050_s18, %s1050_s18 }
  0x1a   :  { %p979_p11 = scmp.ne.s32.totalorder %s1050_s18, %s978_s10  ;;  %p984_p13 = scmp.lt.s32.totalorder %s978_s10, %s978_s10 }
  0x1c   :  { %p985_p0 = por %p984_p13, %p983_p12 }
  0x1e   :  { %p986_p1 = pnand %p985_p0, %p979_p11 }
  0x20   :  { %989 = shalt.err (!%p986_p1)
}
  0x21   :  { %s1020_s0 = smov 64   ;;  %s1021_s11 = smov 4  }
  0x22   :  { %35 = dma.hbm_to_vmem [thread:$0]  %s1178_s2, 3712, %s1050_s18, [#allocation6], %s1020_s0, %s1020_s0, %s1021_s11  }
  0x23   :  { %1012 = dma.done.wait [#allocation3], 32  }
  0x24   :  { %1013 = vsyncadd [#allocation3], 4294967264 }
  0x25   :  { %1014 = dma.done.wait [#allocation6], 3712  }
  0x26   :  { %1015 = vsyncadd [#allocation6], 4294963584  ;;  %v1022_v0 = vmov 0.0   ;;  %vm1023_vm0 = vmmov 0   ;;  %v918_v1 = vld [vmem:[#allocation5] sm:$0xff]   ;;  %v919_v2 = vld [vmem:[#allocation5 + $0x8] sm:$0xff]  }
  0x27   :  { %818 = vmatprep.subr.bf16.mxu1 %v1022_v0  ;;  %834 = vmatprep.mubr.msk.bf16.mxu1 %vm1023_vm0, %v1022_v0  ;;  %v920_v3 = vld [vmem:[#allocation5 + $0x10] sm:$0xff]   ;;  %vm52_vm1 = vcmask 1043456   ;;  %v47_v4 = vld [vmem:[#allocation5 + $0xc0] sm:$0xf]  ;;  %v921_v6 = vld [vmem:[#allocation5 + $0x18] sm:$0xff]   ;;  %vm48_vm2 = vcmask 64512  }
  0x28   :  { %812 = vmatprep.subr.bf16.mxu0 %v1022_v0  ;;  %814 = vmatprep.mubr.msk.bf16.mxu0 %vm1023_vm0, %v1022_v0  ;;  %v45_v5 = vld [vmem:[%s1177_s1] sm:$0x3]  ;;  %v54_v7 = vsel %vm52_vm1, %v47_v4, 0  ;;  %v926_v9 = vld [vmem:[#allocation5 + $0x40] sm:$0xff]   ;;  %v927_v11 = vld [vmem:[#allocation5 + $0x48] sm:$0xff]   ;;  %vm274_vm3 = vcmask 982016  }
  0x29   :  { %819 = vmatpush3.bf16.msra.mxu1 %v918_v1  ;;  %v46_v8 = vpack.c.bf16 %v45_v5, %v45_v5  ;;  %813 = vmatpush3.bf16.msra.mxu0 %v54_v7  ;;  %v922_v10 = vld [vmem:[#allocation5 + $0x20] sm:$0xff]   ;;  %v923_v12 = vld [vmem:[#allocation5 + $0x28] sm:$0xff]   ;;  %v928_v13 = vld [vmem:[#allocation5 + $0x50] sm:$0xff]   ;;  %vm356_vm4 = vcmask 457728   ;;  %vm422_vm5 = vcmask 195584   ;;  %vm535_vm6 = vcmask 1041408  }
  0x2a   :  { %820 = vmatprep.subr.bf16.mxu1 %v1022_v0  ;;  %838 = vmatprep.subr.bf16.mxu0 %v1022_v0  ;;  %v924_v14 = vld [vmem:[#allocation5 + $0x30] sm:$0xff]   ;;  %v929_v15 = vld [vmem:[#allocation5 + $0x58] sm:$0xff]   ;;  %v930_v18 = vld [vmem:[#allocation5 + $0x60] sm:$0xff]   ;;  %vm531_vm7 = vcmask 31744   ;;  %vm603_vm8 = vcmask 261120   ;;  %s1024_s30 = smov [#allocation7]  }
  0x2b   :  { %v925_v16 = vld [vmem:[#allocation5 + $0x38] sm:$0xff]   ;;  %v931_v20 = vld [vmem:[#allocation5 + $0x68] sm:$0xff]   ;;  %v932_v21 = vld [vmem:[#allocation5 + $0x70] sm:$0xff]   ;;  %s722_s5 = sshll.u32 %s1024_s30, 4  ;;  %vm714_vm9 = vcmask 254976   ;;  %s723_s5 = int_to_ptr.vmem [resolvable:$true] %s722_s5 }
  0x2c   :  { %815 = vmatmul.mubr.msk.bf16.vlgmr.msra.gmra.mrb[0].mxu0 %vm48_vm2, %v46_v8  ;;  %v96_v17 = vld [vmem:[#allocation2] sm:$0x3]  ;;  %v933_v22 = vld [vmem:[#allocation5 + $0x78] ss:$0 sps:$4 sm:$0xff]   ;;  %v934_v24 = vld [vmem:[#allocation5 + $0x80] sm:$0xff]   ;;  %s990_s6 = scalar_lea.vmem %s723_s5, 32  ;;  %p995_p3 = scmp.lt.s32.totalorder %s723_s5, %s723_s5 }
  0x2d   :  { %821 = vmatpush3.bf16.msra.mxu1 %v919_v2  ;;  %839 = vmatpush3.bf16.msra.mxu0 %v926_v9  ;;  %v97_v19 = vpack.c.bf16 %v96_v17, %v96_v17  ;;  %v279_v23 = vsel %vm52_vm1, %v933_v22, 0  ;;  %v935_v25 = vld [vmem:[#allocation5 + $0x88] sm:$0xff]   ;;  %v733_v26 = vld [vmem:[%s1179_s3] ss:$0 sm:$0xff]  ;;  %v937_v35 = vld [vmem:[#allocation5 + $0x98] ss:$0 sps:$4 sm:$0xff]   ;;  %p991_p2 = scmp.ne.s32.totalorder %s723_s5, %s990_s6  ;;  %p996_p4 = scmp.lt.s32.totalorder %s990_s6, %s990_s6 }
  0x2e   :  { %822 = vmatprep.subr.bf16.mxu1 %v1022_v0  ;;  %840 = vmatprep.subr.bf16.mxu0 %v1022_v0  ;;  %v936_v34 = vld [vmem:[#allocation5 + $0x90] sm:$0xff]   ;;  %v361_v36 = vsel %vm52_vm1, %v937_v35, 0  ;;  %v938_v37 = vld [vmem:[#allocation5 + $0xa0] sm:$0xff]   ;;  %v939_v46 = vld [vmem:[#allocation5 + $0xa8] ss:$0 sps:$4 sm:$0xff]  }
  0x2f   :  { %854 = vmatprep.mubr.msk.bf16.mxu0 %vm1023_vm0, %v1022_v0  ;;  %v742_v38 = vld [vmem:[%s1179_s3 + $0x1] ss:$0 sm:$0xff]  ;;  %v427_v47 = vsel %vm52_vm1, %v939_v46, 0  ;;  %v752_v48 = vld [vmem:[%s1179_s3 + $0x2] ss:$0 sm:$0xff]  ;;  %v940_v5 = vld [vmem:[#allocation5 + $0xc8] sm:$0xff]   ;;  %p997_p5 = por %p996_p4, %p995_p3 }
  0x30   :  { %v471_v53 = vld [vmem:[#allocation5 + $0xb0] sm:$0xf]  ;;  %v758_v58 = vld [vmem:[%s1179_s3 + $0x3] ss:$0 sm:$0xff] }
  0x31   :  { %823 = vmatpush3.bf16.msra.mxu1 %v920_v3  ;;  %841 = vmatpush3.bf16.msra.mxu0 %v927_v11  ;;  %v481_v57 = vsel %vm52_vm1, %v471_v53, 0  ;;  %v525_v63 = vld [vmem:[#allocation5 + $0xb8] sm:$0x3]  ;;  %p998_p6 = pnand %p997_p5, %p991_p2 }
  0x32   :  { %824 = vmatprep.subr.bf16.mxu1 %v1022_v0  ;;  %842 = vmatprep.subr.bf16.mxu0 %v1022_v0  ;;  %v537_v4 = vsel %vm535_vm6, %v525_v63, 0  ;;  %v942_v22 = vld [vmem:[#allocation5 + $0xd8] sm:$0xff]  }
  0x35   :  { %825 = vmatpush3.bf16.msra.mxu1 %v921_v6  ;;  %843 = vmatpush3.bf16.msra.mxu0 %v928_v13  ;;  %v762_v6 = vld [vmem:[%s1179_s3 + $0x4] ss:$0 sm:$0xff] }
  0x36   :  { %826 = vmatprep.subr.bf16.mxu1 %v1022_v0  ;;  %844 = vmatprep.subr.bf16.mxu0 %v1022_v0 }
  0x39   :  { %827 = vmatpush3.bf16.msra.mxu1 %v922_v10  ;;  %845 = vmatpush3.bf16.msra.mxu0 %v929_v15  ;;  %v764_v15 = vld [vmem:[%s1179_s3 + $0x5] ss:$0 sm:$0xff] }
  0x3a   :  { %828 = vmatprep.subr.bf16.mxu1 %v1022_v0  ;;  %846 = vmatprep.subr.bf16.mxu0 %v1022_v0 }
  0x3d   :  { %829 = vmatpush3.bf16.msra.mxu1 %v923_v12  ;;  %847 = vmatpush3.bf16.msra.mxu0 %v930_v18 }
  0x3e   :  { %830 = vmatprep.subr.bf16.mxu1 %v1022_v0  ;;  %848 = vmatprep.subr.bf16.mxu0 %v1022_v0 }
  0x41   :  { %831 = vmatpush3.bf16.msra.mxu1 %v924_v14  ;;  %849 = vmatpush3.bf16.msra.mxu0 %v931_v20  ;;  %v941_v14 = vld [vmem:[#allocation5 + $0xd0] sm:$0xff]  }
  0x42   :  { %832 = vmatprep.subr.bf16.mxu1 %v1022_v0  ;;  %850 = vmatprep.subr.bf16.mxu0 %v1022_v0 }
  0x45   :  { %833 = vmatpush3.bf16.msra.mxu1 %v925_v16  ;;  %851 = vmatpush3.bf16.msra.mxu0 %v932_v21 }
  0x46   :  { %858 = vmatprep.subr.bf16.mxu1 %v1022_v0  ;;  %852 = vmatprep.subr.bf16.mxu0 %v1022_v0 }
  0x48   :  { %835 = vmatmul.mubr.bf16.vlgmr.msra.gmra.mrb[0].mxu1 %v97_v19 }
  0x49   :  { %866 = vmatprep.mubr.msk.bf16.mxu1 %vm1023_vm0, %v1022_v0  ;;  %853 = vmatpush3.bf16.msra.mxu0 %v279_v23 }
  0x4a   :  { %870 = vmatprep.subr.bf16.mxu0 %v1022_v0  ;;  %859 = vmatpush3.bf16.msra.mxu1 %v934_v24  ;;  %v943_v24 = vld [vmem:[#allocation5 + $0xe0] sm:$0xff]  }
  0x4b   :  { %860 = vmatprep.subr.bf16.mxu1 %v1022_v0 }
  0x4e   :  { %861 = vmatpush3.bf16.msra.mxu1 %v935_v25  ;;  %v766_v25 = vld [vmem:[%s1179_s3 + $0x6] ss:$0 sm:$0xff] }
  0x4f   :  { %862 = vmatprep.subr.bf16.mxu1 %v1022_v0 }
  0x52   :  { %863 = vmatpush3.bf16.msra.mxu1 %v936_v34 }
  0x53   :  { %864 = vmatprep.subr.bf16.mxu1 %v1022_v0 }
  0x56   :  { %865 = vmatpush3.bf16.msra.mxu1 %v361_v36 }
  0x57   :  { %890 = vmatprep.subr.bf16.mxu1 %v1022_v0 }
 0x11b   :  { %v201_v27 = vpop.f32.mrb[0].mxu1 }
 0x11c   :  { %v202_v28 = vadd.f32 %v733_v26, %v201_v27  ;;  %v836_v29 = vpop.f32.mrb[1].mxu1 }
 0x11d   :  { %v204_v30 = vpop.f32.mrb[2].mxu1 }
 0x11e   :  { %v207_v31 = vmax.f32 %v202_v28, 0.0  ;;  %v837_v32 = vpop.f32.mrb[3].mxu1 }
 0x120   :  { %v208_v33 = vpack.c.bf16 %v207_v31, %v207_v31 }
 0x122   :  { %855 = vmatmul.mubr.msk.bf16.vlgmr.msra.gmra.mrb[4].mxu0 %vm274_vm3, %v208_v33  ;;  %v770_v33 = vld [vmem:[%s1179_s3 + $0x7] ss:$0 sm:$0xff] }
 0x123   :  { %874 = vmatprep.mubr.msk.bf16.mxu0 %vm1023_vm0, %v1022_v0  ;;  %871 = vmatpush3.bf16.msra.mxu0 %v938_v37 }
 0x124   :  { %872 = vmatprep.subr.bf16.mxu0 %v1022_v0 }
 0x127   :  { %873 = vmatpush3.bf16.msra.mxu0 %v427_v47 }
 0x128   :  { %878 = vmatprep.subr.bf16.mxu0 %v1022_v0 }
 0x1f5   :  { %v315_v39 = vpop.f32.mrb[4].mxu0 }
 0x1f6   :  { %v316_v40 = vadd.f32 %v742_v38, %v315_v39  ;;  %v856_v41 = vpop.f32.mrb[5].mxu0 }
 0x1f7   :  { %v318_v42 = vpop.f32.mrb[6].mxu0 }
 0x1f8   :  { %v321_v43 = vmax.f32 %v316_v40, 0.0  ;;  %v857_v44 = vpop.f32.mrb[7].mxu0 }
 0x1fa   :  { %v322_v45 = vpack.c.bf16 %v321_v43, %v321_v43 }
 0x1fc   :  { %867 = vmatmul.mubr.msk.bf16.vlgmr.msra.gmra.mrb[4].mxu1 %vm356_vm4, %v322_v45 }
 0x1fd   :  { %894 = vmatprep.mubr.msk.bf16.mxu1 %vm1023_vm0, %v1022_v0  ;;  %891 = vmatpush3.bf16.msra.mxu1 %v940_v5 }
 0x1fe   :  { %892 = vmatprep.subr.bf16.mxu1 %v1022_v0 }
 0x201   :  { %893 = vmatpush3.bf16.msra.mxu1 %v941_v14 }
 0x202   :  { %898 = vmatprep.subr.bf16.mxu1 %v1022_v0 }
 0x2cf   :  { %v397_v49 = vpop.f32.mrb[4].mxu1 }
 0x2d0   :  { %v398_v50 = vadd.f32 %v752_v48, %v397_v49  ;;  %v868_v51 = vpop.f32.mrb[5].mxu1 }
 0x2d1   :  { %v400_v52 = vpop.f32.mrb[6].mxu1 }
 0x2d2   :  { %v403_v54 = vmax.f32 %v398_v50, 0.0  ;;  %v869_v55 = vpop.f32.mrb[7].mxu1 }
 0x2d4   :  { %v404_v56 = vpack.c.bf16 %v403_v54, %v403_v54 }
 0x2d6   :  { %875 = vmatmul.mubr.msk.bf16.vlgmr.msra.gmra.mrb[8].mxu0 %vm422_vm5, %v404_v56 }
 0x2d7   :  { %879 = vmatpush3.bf16.msra.mxu0 %v481_v57  ;;  %880 = vmatprep.mubr.msk.bf16.mxu0 %vm1023_vm0, %v1022_v0 }
 0x2d8   :  { %884 = vmatprep.subr.bf16.mxu0 %v1022_v0 }
 0x3a9   :  { %v463_v59 = vpop.f32.mrb[8].mxu0 }
 0x3aa   :  { %v464_v60 = vadd.f32 %v758_v58, %v463_v59  ;;  %v876_v61 = vpop.f32.mrb[9].mxu0 }
 0x3ab   :  { %v466_v62 = vpop.f32.mrb[10].mxu0 }
 0x3ac   :  { %v469_v1 = vmax.f32 %v464_v60, 0.0  ;;  %v877_v2 = vpop.f32.mrb[11].mxu0 }
 0x3ae   :  { %v470_v3 = vpack.c.bf16 %v469_v1, %v469_v1 }
 0x3b0   :  { %881 = vmatmul.mubr.msk.bf16.vlgmr.msra.gmra.mrb[12].mxu0 %vm48_vm2, %v470_v3 }
 0x3b1   :  { %885 = vmatpush3.bf16.msra.mxu0 %v537_v4  ;;  %886 = vmatprep.mubr.msk.bf16.mxu0 %vm1023_vm0, %v1022_v0 }
 0x483   :  { %v517_v7 = vpop.f32.mrb[12].mxu0 }
 0x484   :  { %v518_v8 = vadd.f32 %v762_v6, %v517_v7  ;;  %v882_v9 = vpop.f32.mrb[13].mxu0 }
 0x485   :  { %v520_v10 = vpop.f32.mrb[14].mxu0 }
 0x486   :  { %v523_v11 = vmax.f32 %v518_v8, 0.0  ;;  %v883_v12 = vpop.f32.mrb[15].mxu0 }
 0x488   :  { %v524_v13 = vpack.c.bf16 %v523_v11, %v523_v11 }
 0x48a   :  { %887 = vmatmul.mubr.msk.bf16.vlgmr.msra.gmra.mrb[0].mxu0 %vm531_vm7, %v524_v13 }
 0x55d   :  { %v573_v16 = vpop.f32.mrb[0].mxu0 }
 0x55e   :  { %v574_v17 = vadd.f32 %v764_v15, %v573_v16  ;;  %v888_v18 = vpop.f32.mrb[1].mxu0 }
 0x55f   :  { %v576_v19 = vpop.f32.mrb[2].mxu0 }
 0x560   :  { %v580_v20 = vmax.f32 %v574_v17, 0.0  ;;  %v889_v21 = vpop.f32.mrb[3].mxu0 }
 0x562   :  { %v581_v23 = vpack.c.bf16 %v580_v20, %v580_v20 }
 0x564   :  { %895 = vmatmul.mubr.msk.bf16.vlgmr.msra.gmra.mrb[8].mxu1 %vm603_vm8, %v581_v23 }
 0x565   :  { %899 = vmatpush3.bf16.msra.mxu1 %v942_v22  ;;  %902 = vmatprep.mubr.msk.bf16.mxu1 %vm1023_vm0, %v1022_v0 }
 0x566   :  { %900 = vmatprep.subr.bf16.mxu1 %v1022_v0 }
 0x569   :  { %901 = vmatpush3.bf16.msra.mxu1 %v943_v24 }
 0x637   :  { %v641_v26 = vpop.f32.mrb[8].mxu1 }
 0x638   :  { %v642_v27 = vadd.f32 %v766_v25, %v641_v26  ;;  %v896_v28 = vpop.f32.mrb[9].mxu1 }
 0x639   :  { %v644_v29 = vpop.f32.mrb[10].mxu1 }
 0x63a   :  { %v647_v30 = vmax.f32 %v642_v27, 0.0  ;;  %v897_v31 = vpop.f32.mrb[11].mxu1 }
 0x63c   :  { %v648_v32 = vpack.c.bf16 %v647_v30, %v647_v30 }
 0x63e   :  { %903 = vmatmul.mubr.msk.bf16.vlgmr.msra.gmra.mrb[12].mxu1 %vm603_vm8, %v648_v32 }
 0x711   :  { %v707_v0 = vpop.f32.mrb[12].mxu1 }
 0x712   :  { %v708_v34 = vadd.f32 %v770_v33, %v707_v0  ;;  %v904_v35 = vpop.f32.mrb[13].mxu1 }
 0x713   :  { %v710_v36 = vpop.f32.mrb[14].mxu1 }
 0x714   :  { %944 = vtanh.f32 %v708_v34  ;;  %v905_v37 = vpop.f32.mrb[15].mxu1 }
 0x71e   :  { %v945_v38 = vpop.eup %944 }
 0x71f   :  { %715 = vst.msk [vmem:[#allocation7] sm:$0x3] %vm714_vm9, %v945_v38 }
 0x720   :  { %1001 = shalt.err (!%p998_p6)
}
 0x721   :  { %s1002_s8 = scalar_lea.hbm %s1180_s4, 32 }
 0x722   :  { %p1003_p7 = scmp.ne.s32.totalorder %s1180_s4, %s1002_s8  ;;  %p1006_p8 = scmp.lt.u32.totalorder %s1002_s8, %s1180_s4 }
 0x724   :  { %p1008_p9 = pnand %p1006_p8, %p1003_p7 }
 0x726   :  { %1011 = shalt.err (!%p1008_p9)
}
 0x727   :  { %725 = dma.vmem_to_hbm [thread:$0]  %s723_s5, 32, %s1180_s4, [#allocation4]  }
 0x728   :  { %1016 = dma.done.wait [#allocation4], 32  }
 0x729   :  { %1017 = vsyncadd [#allocation4], 4294967264 }
 0x72a   :  { %729 = vsyncpa [#allocation3], 1 }
 0x72b   :  { %730 = vsyncpa [#allocation6], 1 }
 0x72c   :  { %731 = vsyncpa [#allocation4], 1 }

</bundles_post_ra>
